<compile_context>
chip_gen: v7x
topology: tpu7x:2x2x1
jax: 0.10.0
libtpu: 0.0.40
codegen_flags: <defaults>
</compile_context>

<pallas_src>
import functools

import jax
import jax.numpy as jnp
from jax.experimental import pallas as pl
from jax.experimental.pallas import tpu as pltpu


def _round_up(x, m):
    return ((x + m - 1) // m) * m


def _row_multiple(dtype):
    # Sublane packing: 8 rows for 4-byte, 16 for 2-byte, 32 for 1-byte dtypes.
    return {4: 8, 2: 16, 1: 32}.get(jnp.dtype(dtype).itemsize, 8)


def _vmem_phys_bytes():
    try:
        cap = int(pltpu.get_tpu_info().vmem_capacity_bytes)
        if cap > 0:
            return cap
    except Exception:
        pass
    return 64 << 20  # conservative default (v7x per-TensorCore); safe on all generations


def _block_spec(shape, index_map, buffers=None):
    """BlockSpec with optional explicit buffer count; falls back if unsupported."""
    if buffers is None:
        return pl.BlockSpec(shape, index_map)
    try:
        return pl.BlockSpec(shape, index_map, pipeline_mode=pl.Buffered(buffers))
    except TypeError:
        return pl.BlockSpec(shape, index_map)


def mlp_kernel(x_ref, w1_ref, b1_ref, w2_ref, b2_ref, o_ref, h_ref, acc_ref):
    k = pl.program_id(1)

    @pl.when(k == 0)
    def _():
        acc_ref[...] = jnp.zeros_like(acc_ref)

    # Layer 0 (hidden chunk): Linear(input -> hidden_chunk) + bias + ReLU, f32 MXU accumulation.
    h = jnp.dot(x_ref[...], w1_ref[...], preferred_element_type=jnp.float32)
    h = jnp.maximum(h + b1_ref[...], 0.0)
    # Stage (and cast) the hidden chunk in VMEM scratch to keep vregs free.
    h_ref[...] = h.astype(h_ref.dtype)

    # Layer 1 partial: hidden_chunk @ W2^T chunk, accumulated in f32.
    acc_ref[...] += jnp.dot(h_ref[...], w2_ref[...], preferred_element_type=jnp.float32)

    @pl.when(k == pl.num_programs(1) - 1)
    def _():
        o_ref[...] = (acc_ref[...] + b2_ref[...]).astype(o_ref.dtype)


@functools.partial(
    jax.jit,
    static_argnames=("tm", "compute_dtype", "out_dtype", "single_buffer_weights"),
)
def mlp_forward(x, w1, b1, w2, b2, *, tm=None, compute_dtype=None, out_dtype=None,
                single_buffer_weights=True):
    """x: [..., input_dim] -> [..., output_dim].

    Matches PyTorch MLP(num_layers=2): ReLU(x @ W1.T + b1) @ W2.T + b2.
    Weights use the PyTorch convention W[out, in]; they are transposed once here.
    compute_dtype controls matmul operand dtype (e.g. jnp.bfloat16); accumulation is f32.
    """
    if compute_dtype is None:
        compute_dtype = x.dtype   # strict-parity default; pass jnp.bfloat16 for MXU peak
    if out_dtype is None:
        out_dtype = x.dtype

    input_dim = x.shape[-1]
    hidden_dim = w1.shape[0]
    output_dim = w2.shape[0]
    lead = x.shape[:-1]

    cbytes = jnp.dtype(compute_dtype).itemsize
    obytes = jnp.dtype(out_dtype).itemsize

    # ---- lane-dense padding of every feature axis (zeros are inert here) ----
    dp = _round_up(input_dim, 128)
    hp = _round_up(hidden_dim, 128)
    op = _round_up(output_dim, 128)

    xf = x.reshape(-1, input_dim)
    m = xf.shape[0]

    # ---- generation-aware VMEM budget ---------------------------------------
    phys = _vmem_phys_bytes()
    headroom = (8 << 20) if phys <= (64 << 20) else (20 << 20)
    vmem_cap = phys - headroom

    # ---- hidden-axis (K) tiling decision ------------------------------------
    weight_budget = int(vmem_cap * 0.45)
    full_weight_bytes = (dp * hp + hp * op) * cbytes + (hp + op) * 4
    if full_weight_bytes <= weight_budget:
        th = hp                      # fully resident weights, single K step
        num_k = 1
        wbuf = 1 if single_buffer_weights else None
        weight_bytes = full_weight_bytes if single_buffer_weights else 2 * full_weight_bytes
    else:
        # Stream double-buffered hidden chunks (multiple of 128 columns of W1^T / rows of W2^T).
        per_chunk = 2 * (dp * 128 + 128 * op) * cbytes + 2 * 128 * 4
        th = max(128, (max(weight_budget - op * 4, per_chunk) // per_chunk) * 128)
        th = min(th, hp)
        hp = _round_up(hp, th)       # re-pad hidden so chunks tile evenly (zeros inert)
        num_k = hp // th
        wbuf = None                  # streamed blocks need double buffering
        weight_bytes = 2 * (dp * th + th * op) * cbytes + 2 * th * 4 + op * 4

    # ---- row tile derived from leftover VMEM --------------------------------
    row_mult = max(_row_multiple(compute_dtype), _row_multiple(out_dtype))
    per_row = 2 * dp * cbytes + 2 * op * obytes + th * cbytes + op * 4
    avail = max(vmem_cap - weight_bytes - (2 << 20), per_row * row_mult)
    tm_fit = max(row_mult, avail // per_row)
    if tm is None:
        tm_cands = (1024, 768, 512, 384, 256, 128, 64, 32, 16, 8)
        tm = next((c for c in tm_cands if c <= tm_fit and c % row_mult == 0), row_mult)
    else:
        tm = _round_up(int(tm), row_mult)
    # Clamp for small batches: don't pad a tiny row count up to a huge tile.
    tm = max(row_mult, min(tm, _round_up(m, row_mult)))

    mp = _round_up(m, tm)

    # ---- pad / pre-transpose operands (done once, outside the kernel) -------
    xf = jnp.pad(xf, ((0, mp - m), (0, dp - input_dim))).astype(compute_dtype)
    w1t = jnp.pad(w1.T, ((0, dp - input_dim), (0, hp - hidden_dim))).astype(compute_dtype)
    w2t = jnp.pad(w2.T, ((0, hp - hidden_dim), (0, op - output_dim))).astype(compute_dtype)
    b1r = jnp.pad(b1, (0, hp - hidden_dim)).reshape(1, hp).astype(jnp.float32)
    b2r = jnp.pad(b2, (0, op - output_dim)).reshape(1, op).astype(jnp.float32)

    # ---- VMEM request (with margin, never the full physical capacity) -------
    io_bytes = 2 * tm * dp * cbytes + 2 * tm * op * obytes
    scratch_bytes = tm * th * cbytes + tm * op * 4
    needed = weight_bytes + io_bytes + scratch_bytes
    vmem_limit = int(min(max(needed + (4 << 20), 16 << 20), vmem_cap))

    out = pl.pallas_call(
        mlp_kernel,
        out_shape=jax.ShapeDtypeStruct((mp, op), out_dtype),
        grid_spec=pltpu.PrefetchScalarGridSpec(
            num_scalar_prefetch=0,
            grid=(mp // tm, num_k),
            in_specs=[
                pl.BlockSpec((tm, dp), lambda i, k: (i, 0)),               # x row tile
                _block_spec((dp, th), lambda i, k: (0, k), buffers=wbuf),  # W1^T chunk
                _block_spec((1, th), lambda i, k: (0, k), buffers=wbuf),   # b1 chunk
                _block_spec((th, op), lambda i, k: (k, 0), buffers=wbuf),  # W2^T chunk
                _block_spec((1, op), lambda i, k: (0, 0), buffers=1),      # b2 (resident)
            ],
            out_specs=pl.BlockSpec((tm, op), lambda i, k: (i, 0)),
            scratch_shapes=[
                pltpu.VMEM((tm, th), compute_dtype),   # staged hidden chunk
                pltpu.VMEM((tm, op), jnp.float32),     # f32 output accumulator
            ],
        ),
        compiler_params=pltpu.CompilerParams(
            dimension_semantics=("parallel", "arbitrary"),
            vmem_limit_bytes=vmem_limit,
        ),
    )(xf, w1t, b1r, w2t, b2r)

    out = out[:m, :output_dim]
    return out.reshape(*lead, output_dim)


def init_mlp_params(key, input_dim, hidden_dim, output_dim):
    """Deterministic init mimicking nn.Linear's kaiming-uniform defaults."""
    k1, k2, k3, k4 = jax.random.split(key, 4)
    bound1 = 1.0 / (input_dim ** 0.5)
    bound2 = 1.0 / (hidden_dim ** 0.5)
    w1 = jax.random.uniform(k1, (hidden_dim, input_dim), jnp.float32, -bound1, bound1)
    b1 = jax.random.uniform(k2, (hidden_dim,), jnp.float32, -bound1, bound1)
    w2 = jax.random.uniform(k3, (output_dim, hidden_dim), jnp.float32, -bound2, bound2)
    b2 = jax.random.uniform(k4, (output_dim,), jnp.float32, -bound2, bound2)
    return w1, b1, w2, b2


if __name__ == "__main__":
    key = jax.random.PRNGKey(0)
    kx, kp = jax.random.split(key)

    batch, seq = 2, 8
    input_dim, hidden_dim, output_dim = 32, 64, 32

    x = jax.random.normal(kx, (batch, seq, input_dim), jnp.float32)
    w1, b1, w2, b2 = init_mlp_params(kp, input_dim, hidden_dim, output_dim)

    # Reference in plain JAX (same math as the PyTorch forward).
    ref = jnp.maximum(x @ w1.T + b1, 0.0) @ w2.T + b2

    # f32 strict-parity path.  If single-buffered weight blocks are rejected by this
    # Pallas version, fall back to default double-buffering (correctness identical).
    sbw = True
    try:
        out_f32 = jax.block_until_ready(mlp_forward(x, w1, b1, w2, b2))
    except Exception:
        sbw = False
        out_f32 = jax.block_until_ready(
            mlp_forward(x, w1, b1, w2, b2, single_buffer_weights=False))
    assert out_f32.shape == (batch, seq, output_dim)
    assert jnp.allclose(out_f32, ref, atol=1e-5, rtol=1e-5)

    # bf16 matmul-operand path (MXU peak on v5e/v6e/v7x): loose check, f32 accumulation.
    out_bf16 = jax.block_until_ready(
        mlp_forward(x, w1, b1, w2, b2, compute_dtype=jnp.bfloat16,
                    single_buffer_weights=sbw))
    assert out_bf16.shape == (batch, seq, output_dim)
    assert jnp.allclose(out_bf16, ref, atol=5e-2, rtol=5e-2)

    # TODO(synk): optional fp8-weight path for v7x (per-channel scales folded into bias)
    # is not implemented; bf16 is the lowest-precision operand path here.
    print("KERNEL_OK")
</pallas_src>

<mosaic_0001>
module attributes {stable_mosaic.version = 11 : i64} {
  func.func @mlp_kernel(%arg0: i32, %arg1: i32, %arg2: memref<16x128xf32, #tpu.memory_space<vmem>>, %arg3: memref<128x128xf32, #tpu.memory_space<vmem>>, %arg4: memref<1x128xf32, #tpu.memory_space<vmem>>, %arg5: memref<128x128xf32, #tpu.memory_space<vmem>>, %arg6: memref<1x128xf32, #tpu.memory_space<vmem>>, %arg7: memref<16x128xf32, #tpu.memory_space<vmem>>, %arg8: memref<16x128xf32, #tpu.memory_space<vmem>>, %arg9: memref<16x128xf32, #tpu.memory_space<vmem>>) attributes {dimension_semantics = [#tpu.dimension_semantics<parallel>, #tpu.dimension_semantics<arbitrary>], iteration_bounds = array<i64: 1, 1>, scalar_prefetch = 0 : i64, scratch_operands = 2 : i64, tpu.core_type = #tpu.core_type<tc>, window_params = [{transform_indices = @transform_0, window_bounds = array<i64: 16, 128>}, {pipeline_mode = #tpu.pipeline_mode<synchronous>, transform_indices = @transform_1, window_bounds = array<i64: 128, 128>}, {pipeline_mode = #tpu.pipeline_mode<synchronous>, transform_indices = @transform_2, window_bounds = array<i64: 1, 128>}, {pipeline_mode = #tpu.pipeline_mode<synchronous>, transform_indices = @transform_3, window_bounds = array<i64: 128, 128>}, {pipeline_mode = #tpu.pipeline_mode<synchronous>, transform_indices = @transform_4, window_bounds = array<i64: 1, 128>}, {transform_indices = @transform_5, window_bounds = array<i64: 16, 128>}]} {
    %c0_i32 = arith.constant 0 : i32
    %0 = arith.cmpi eq, %arg1, %c0_i32 : i32
    %1 = arith.extui %0 : i1 to i32
    %c0_i32_0 = arith.constant 0 : i32
    %2 = arith.cmpi ne, %1, %c0_i32_0 : i32
    scf.if %2 {
      %cst_20 = arith.constant 0.000000e+00 : f32
      %21 = vector.broadcast %cst_20 : f32 to vector<16x128xf32>
      %c0_21 = arith.constant 0 : index
      %c0_22 = arith.constant 0 : index
      %22 = vector.load %arg9[%c0_21, %c0_22] : memref<16x128xf32, #tpu.memory_space<vmem>>, vector<16x128xf32>
      tpu.vector_store %arg9[%c0_21, %c0_22], %21 {strides = array<i32>} : memref<16x128xf32, #tpu.memory_space<vmem>>, vector<16x128xf32>,
    } else {
    }
    %c0 = arith.constant 0 : index
    %c0_1 = arith.constant 0 : index
    %3 = vector.load %arg2[%c0, %c0_1] : memref<16x128xf32, #tpu.memory_space<vmem>>, vector<16x128xf32>
    %c0_2 = arith.constant 0 : index
    %c0_3 = arith.constant 0 : index
    %4 = vector.load %arg3[%c0_2, %c0_3] : memref<128x128xf32, #tpu.memory_space<vmem>>, vector<128x128xf32>
    %cst = arith.constant dense<0.000000e+00> : vector<16x128xf32>
    %5 = tpu.matmul %3, %4, %cst {dimension_numbers = #tpu.dot_dimension_numbers<[1], [0], [0], [1], [0, 0, 1, 1], [], []>} : vector<16x128xf32>, vector<128x128xf32>, vector<16x128xf32> -> vector<16x128xf32>
    %c0_4 = arith.constant 0 : index
    %c0_5 = arith.constant 0 : index
    %6 = vector.load %arg4[%c0_4, %c0_5] : memref<1x128xf32, #tpu.memory_space<vmem>>, vector<1x128xf32>
    %7 = vector.broadcast %6 : vector<1x128xf32> to vector<16x128xf32>
    %8 = arith.addf %5, %7 : vector<16x128xf32>
    %cst_6 = arith.constant 0.000000e+00 : f32
    %9 = vector.broadcast %cst_6 : f32 to vector<16x128xf32>
    %10 = arith.maximumf %8, %9 : vector<16x128xf32>
    %c0_7 = arith.constant 0 : index
    %c0_8 = arith.constant 0 : index
    %11 = vector.load %arg8[%c0_7, %c0_8] : memref<16x128xf32, #tpu.memory_space<vmem>>, vector<16x128xf32>
    tpu.vector_store %arg8[%c0_7, %c0_8], %10 {strides = array<i32>} : memref<16x128xf32, #tpu.memory_space<vmem>>, vector<16x128xf32>,
    %c0_9 = arith.constant 0 : index
    %c0_10 = arith.constant 0 : index
    %12 = vector.load %arg9[%c0_9, %c0_10] : memref<16x128xf32, #tpu.memory_space<vmem>>, vector<16x128xf32>
    %c0_11 = arith.constant 0 : index
    %c0_12 = arith.constant 0 : index
    %13 = vector.load %arg8[%c0_11, %c0_12] : memref<16x128xf32, #tpu.memory_space<vmem>>, vector<16x128xf32>
    %c0_13 = arith.constant 0 : index
    %c0_14 = arith.constant 0 : index
    %14 = vector.load %arg5[%c0_13, %c0_14] : memref<128x128xf32, #tpu.memory_space<vmem>>, vector<128x128xf32>
    %cst_15 = arith.constant dense<0.000000e+00> : vector<16x128xf32>
    %15 = tpu.matmul %13, %14, %cst_15 {dimension_numbers = #tpu.dot_dimension_numbers<[1], [0], [0], [1], [0, 0, 1, 1], [], []>} : vector<16x128xf32>, vector<128x128xf32>, vector<16x128xf32> -> vector<16x128xf32>
    %16 = arith.addf %12, %15 : vector<16x128xf32>
    %c0_16 = arith.constant 0 : index
    %c0_17 = arith.constant 0 : index
    %17 = vector.load %arg9[%c0_16, %c0_17] : memref<16x128xf32, #tpu.memory_space<vmem>>, vector<16x128xf32>
    tpu.vector_store %arg9[%c0_16, %c0_17], %16 {strides = array<i32>} : memref<16x128xf32, #tpu.memory_space<vmem>>, vector<16x128xf32>,
    %c0_i32_18 = arith.constant 0 : i32
    %18 = arith.cmpi eq, %arg1, %c0_i32_18 : i32
    %19 = arith.extui %18 : i1 to i32
    %c0_i32_19 = arith.constant 0 : i32
    %20 = arith.cmpi ne, %19, %c0_i32_19 : i32
    scf.if %20 {
      %c0_20 = arith.constant 0 : index
      %c0_21 = arith.constant 0 : index
      %21 = vector.load %arg9[%c0_20, %c0_21] : memref<16x128xf32, #tpu.memory_space<vmem>>, vector<16x128xf32>
      %c0_22 = arith.constant 0 : index
      %c0_23 = arith.constant 0 : index
      %22 = vector.load %arg6[%c0_22, %c0_23] : memref<1x128xf32, #tpu.memory_space<vmem>>, vector<1x128xf32>
      %23 = vector.broadcast %22 : vector<1x128xf32> to vector<16x128xf32>
      %24 = arith.addf %21, %23 : vector<16x128xf32>
      %c0_24 = arith.constant 0 : index
      %c0_25 = arith.constant 0 : index
      %25 = vector.load %arg7[%c0_24, %c0_25] : memref<16x128xf32, #tpu.memory_space<vmem>>, vector<16x128xf32>
      tpu.vector_store %arg7[%c0_24, %c0_25], %24 {strides = array<i32>} : memref<16x128xf32, #tpu.memory_space<vmem>>, vector<16x128xf32>,
    } else {
    }
    return
  }
  func.func @transform_0(%arg0: i32, %arg1: i32) -> (i32, i32) {
    %c0_i32 = arith.constant 0 : i32
    %c0_i32_0 = arith.constant 0 : i32
    return %arg0, %c0_i32 : i32, i32
  }
  func.func @transform_1(%arg0: i32, %arg1: i32) -> (i32, i32) {
    %c0_i32 = arith.constant 0 : i32
    %c0_i32_0 = arith.constant 0 : i32
    return %c0_i32, %arg1 : i32, i32
  }
  func.func @transform_2(%arg0: i32, %arg1: i32) -> (i32, i32) {
    %c0_i32 = arith.constant 0 : i32
    %c0_i32_0 = arith.constant 0 : i32
    return %c0_i32, %arg1 : i32, i32
  }
  func.func @transform_3(%arg0: i32, %arg1: i32) -> (i32, i32) {
    %c0_i32 = arith.constant 0 : i32
    %c0_i32_0 = arith.constant 0 : i32
    return %arg1, %c0_i32 : i32, i32
  }
  func.func @transform_4(%arg0: i32, %arg1: i32) -> (i32, i32) {
    %c0_i32 = arith.constant 0 : i32
    %c0_i32_0 = arith.constant 0 : i32
    %c0_i32_1 = arith.constant 0 : i32
    return %c0_i32, %c0_i32_0 : i32, i32
  }
  func.func @transform_5(%arg0: i32, %arg1: i32) -> (i32, i32) {
    %c0_i32 = arith.constant 0 : i32
    %c0_i32_0 = arith.constant 0 : i32
    return %arg0, %c0_i32 : i32, i32
  }
}

module attributes {stable_mosaic.version = 11 : i64} {
  func.func @mlp_kernel(%arg0: i32, %arg1: i32, %arg2: memref<16x128xf32, #tpu.memory_space<vmem>>, %arg3: memref<128x128xf32, #tpu.memory_space<vmem>>, %arg4: memref<1x128xf32, #tpu.memory_space<vmem>>, %arg5: memref<128x128xf32, #tpu.memory_space<vmem>>, %arg6: memref<1x128xf32, #tpu.memory_space<vmem>>, %arg7: memref<16x128xf32, #tpu.memory_space<vmem>>, %arg8: memref<16x128xf32, #tpu.memory_space<vmem>>, %arg9: memref<16x128xf32, #tpu.memory_space<vmem>>) attributes {dimension_semantics = [#tpu.dimension_semantics<parallel>, #tpu.dimension_semantics<arbitrary>], iteration_bounds = array<i64: 1, 1>, scalar_prefetch = 0 : i64, scratch_operands = 2 : i64, tpu.core_type = #tpu.core_type<tc>, window_params = [{transform_indices = @transform_0, window_bounds = array<i64: 16, 128>}, {transform_indices = @transform_1, window_bounds = array<i64: 128, 128>}, {transform_indices = @transform_2, window_bounds = array<i64: 1, 128>}, {transform_indices = @transform_3, window_bounds = array<i64: 128, 128>}, {pipeline_mode = #tpu.pipeline_mode<synchronous>, transform_indices = @transform_4, window_bounds = array<i64: 1, 128>}, {transform_indices = @transform_5, window_bounds = array<i64: 16, 128>}]} {
    %c0_i32 = arith.constant 0 : i32
    %0 = arith.cmpi eq, %arg1, %c0_i32 : i32
    %1 = arith.extui %0 : i1 to i32
    %c0_i32_0 = arith.constant 0 : i32
    %2 = arith.cmpi ne, %1, %c0_i32_0 : i32
    scf.if %2 {
      %cst_20 = arith.constant 0.000000e+00 : f32
      %21 = vector.broadcast %cst_20 : f32 to vector<16x128xf32>
      %c0_21 = arith.constant 0 : index
      %c0_22 = arith.constant 0 : index
      %22 = vector.load %arg9[%c0_21, %c0_22] : memref<16x128xf32, #tpu.memory_space<vmem>>, vector<16x128xf32>
      tpu.vector_store %arg9[%c0_21, %c0_22], %21 {strides = array<i32>} : memref<16x128xf32, #tpu.memory_space<vmem>>, vector<16x128xf32>,
    } else {
    }
    %c0 = arith.constant 0 : index
    %c0_1 = arith.constant 0 : index
    %3 = vector.load %arg2[%c0, %c0_1] : memref<16x128xf32, #tpu.memory_space<vmem>>, vector<16x128xf32>
    %c0_2 = arith.constant 0 : index
    %c0_3 = arith.constant 0 : index
    %4 = vector.load %arg3[%c0_2, %c0_3] : memref<128x128xf32, #tpu.memory_space<vmem>>, vector<128x128xf32>
    %cst = arith.constant dense<0.000000e+00> : vector<16x128xf32>
    %5 = tpu.matmul %3, %4, %cst {dimension_numbers = #tpu.dot_dimension_numbers<[1], [0], [0], [1], [0, 0, 1, 1], [], []>} : vector<16x128xf32>, vector<128x128xf32>, vector<16x128xf32> -> vector<16x128xf32>
    %c0_4 = arith.constant 0 : index
    %c0_5 = arith.constant 0 : index
    %6 = vector.load %arg4[%c0_4, %c0_5] : memref<1x128xf32, #tpu.memory_space<vmem>>, vector<1x128xf32>
    %7 = vector.broadcast %6 : vector<1x128xf32> to vector<16x128xf32>
    %8 = arith.addf %5, %7 : vector<16x128xf32>
    %cst_6 = arith.constant 0.000000e+00 : f32
    %9 = vector.broadcast %cst_6 : f32 to vector<16x128xf32>
    %10 = arith.maximumf %8, %9 : vector<16x128xf32>
    %c0_7 = arith.constant 0 : index
    %c0_8 = arith.constant 0 : index
    %11 = vector.load %arg8[%c0_7, %c0_8] : memref<16x128xf32, #tpu.memory_space<vmem>>, vector<16x128xf32>
    tpu.vector_store %arg8[%c0_7, %c0_8], %10 {strides = array<i32>} : memref<16x128xf32, #tpu.memory_space<vmem>>, vector<16x128xf32>,
    %c0_9 = arith.constant 0 : index
    %c0_10 = arith.constant 0 : index
    %12 = vector.load %arg9[%c0_9, %c0_10] : memref<16x128xf32, #tpu.memory_space<vmem>>, vector<16x128xf32>
    %c0_11 = arith.constant 0 : index
    %c0_12 = arith.constant 0 : index
    %13 = vector.load %arg8[%c0_11, %c0_12] : memref<16x128xf32, #tpu.memory_space<vmem>>, vector<16x128xf32>
    %c0_13 = arith.constant 0 : index
    %c0_14 = arith.constant 0 : index
    %14 = vector.load %arg5[%c0_13, %c0_14] : memref<128x128xf32, #tpu.memory_space<vmem>>, vector<128x128xf32>
    %cst_15 = arith.constant dense<0.000000e+00> : vector<16x128xf32>
    %15 = tpu.matmul %13, %14, %cst_15 {dimension_numbers = #tpu.dot_dimension_numbers<[1], [0], [0], [1], [0, 0, 1, 1], [], []>} : vector<16x128xf32>, vector<128x128xf32>, vector<16x128xf32> -> vector<16x128xf32>
    %16 = arith.addf %12, %15 : vector<16x128xf32>
    %c0_16 = arith.constant 0 : index
    %c0_17 = arith.constant 0 : index
    %17 = vector.load %arg9[%c0_16, %c0_17] : memref<16x128xf32, #tpu.memory_space<vmem>>, vector<16x128xf32>
    tpu.vector_store %arg9[%c0_16, %c0_17], %16 {strides = array<i32>} : memref<16x128xf32, #tpu.memory_space<vmem>>, vector<16x128xf32>,
    %c0_i32_18 = arith.constant 0 : i32
    %18 = arith.cmpi eq, %arg1, %c0_i32_18 : i32
    %19 = arith.extui %18 : i1 to i32
    %c0_i32_19 = arith.constant 0 : i32
    %20 = arith.cmpi ne, %19, %c0_i32_19 : i32
    scf.if %20 {
      %c0_20 = arith.constant 0 : index
      %c0_21 = arith.constant 0 : index
      %21 = vector.load %arg9[%c0_20, %c0_21] : memref<16x128xf32, #tpu.memory_space<vmem>>, vector<16x128xf32>
      %c0_22 = arith.constant 0 : index
      %c0_23 = arith.constant 0 : index
      %22 = vector.load %arg6[%c0_22, %c0_23] : memref<1x128xf32, #tpu.memory_space<vmem>>, vector<1x128xf32>
      %23 = vector.broadcast %22 : vector<1x128xf32> to vector<16x128xf32>
      %24 = arith.addf %21, %23 : vector<16x128xf32>
      %c0_24 = arith.constant 0 : index
      %c0_25 = arith.constant 0 : index
      %25 = vector.load %arg7[%c0_24, %c0_25] : memref<16x128xf32, #tpu.memory_space<vmem>>, vector<16x128xf32>
      tpu.vector_store %arg7[%c0_24, %c0_25], %24 {strides = array<i32>} : memref<16x128xf32, #tpu.memory_space<vmem>>, vector<16x128xf32>,
    } else {
    }
    return
  }
  func.func @transform_0(%arg0: i32, %arg1: i32) -> (i32, i32) {
    %c0_i32 = arith.constant 0 : i32
    %c0_i32_0 = arith.constant 0 : i32
    return %arg0, %c0_i32 : i32, i32
  }
  func.func @transform_1(%arg0: i32, %arg1: i32) -> (i32, i32) {
    %c0_i32 = arith.constant 0 : i32
    %c0_i32_0 = arith.constant 0 : i32
    return %c0_i32, %arg1 : i32, i32
  }
  func.func @transform_2(%arg0: i32, %arg1: i32) -> (i32, i32) {
    %c0_i32 = arith.constant 0 : i32
    %c0_i32_0 = arith.constant 0 : i32
    return %c0_i32, %arg1 : i32, i32
  }
  func.func @transform_3(%arg0: i32, %arg1: i32) -> (i32, i32) {
    %c0_i32 = arith.constant 0 : i32
    %c0_i32_0 = arith.constant 0 : i32
    return %arg1, %c0_i32 : i32, i32
  }
  func.func @transform_4(%arg0: i32, %arg1: i32) -> (i32, i32) {
    %c0_i32 = arith.constant 0 : i32
    %c0_i32_0 = arith.constant 0 : i32
    %c0_i32_1 = arith.constant 0 : i32
    return %c0_i32, %c0_i32_0 : i32, i32
  }
  func.func @transform_5(%arg0: i32, %arg1: i32) -> (i32, i32) {
    %c0_i32 = arith.constant 0 : i32
    %c0_i32_0 = arith.constant 0 : i32
    return %arg0, %c0_i32 : i32, i32
  }
}

</mosaic_0001>

<bundles_post_ra>
// kernel: mlp_forward.1
= control target key start
LH: loop header
LB: loop body
LE: loop exit
PB: predicated region body
PF: predicated region fallthrough
CT: control target
= control target key end

     0   :  { %s565_s1 = inlined_call_operand.vmem [shape: f32[128,128], index: 1, kind: input, shape index: {}]   ;;  %s566_s0 = inlined_call_operand.vmem [shape: f32[16,128], index: 0, kind: input, shape index: {}]   ;;  %s567_s3 = inlined_call_operand.vmem [shape: f32[128,128], index: 3, kind: input, shape index: {}]   ;;  %s568_s2 = inlined_call_operand.vmem [shape: f32[1,128], index: 2, kind: input, shape index: {}]   ;;  %s569_s4 = inlined_call_operand.vmem [shape: f32[1,128], index: 4, kind: input, shape index: {}]   ;;  %s570_s5 = inlined_call_operand.vmem [shape: f32[16,128], index: 5, kind: output, shape index: {}]  }
   0x1   :  { %v28_v0 = vld [vmem:[%s565_s1] sm:$0xff]  ;;  %v29_v1 = vld [vmem:[%s565_s1 + $0x8] sm:$0xff]  ;;  %v30_v2 = vld [vmem:[%s565_s1 + $0x10] sm:$0xff] }
   0x2   :  { %v357_v3 = vpack.c.bf16 %v29_v1, %v28_v0  ;;  %v31_v4 = vld [vmem:[%s565_s1 + $0x18] sm:$0xff]  ;;  %v32_v6 = vld [vmem:[%s565_s1 + $0x20] sm:$0xff]  ;;  %v33_v7 = vld [vmem:[%s565_s1 + $0x28] sm:$0xff] }
   0x3   :  { %v361_v5 = vpack.c.bf16 %v31_v4, %v30_v2  ;;  %v365_v8 = vpack.c.bf16 %v33_v7, %v32_v6  ;;  %v34_v9 = vld [vmem:[%s565_s1 + $0x30] sm:$0xff]  ;;  %v35_v10 = vld [vmem:[%s565_s1 + $0x38] sm:$0xff]  ;;  %v26_v11 = vld [vmem:[%s566_s0] sm:$0xff] }
   0x4   :  { %358 = vmatprep.subr.bf16.mxu0 %v357_v3  ;;  %319 = vmatprep.mubr.f32.mxu0 %v26_v11  ;;  %v134_v12 = vld [vmem:[%s567_s3] sm:$0xff]  ;;  %v135_v13 = vld [vmem:[%s567_s3 + $0x8] sm:$0xff]  ;;  %v136_v14 = vld [vmem:[%s567_s3 + $0x10] sm:$0xff]  ;;  %v369_v20 = vpack.c.bf16 %v35_v10, %v34_v9 }
   0x5   :  { %360 = vmatpush3.bf16.msra.mxu0 %v357_v3  ;;  %v389_v15 = vpack.c.bf16 %v135_v13, %v134_v12  ;;  %v137_v16 = vld [vmem:[%s567_s3 + $0x18] sm:$0xff]  ;;  %v138_v18 = vld [vmem:[%s567_s3 + $0x20] sm:$0xff]  ;;  %v139_v19 = vld [vmem:[%s567_s3 + $0x28] sm:$0xff] }
   0x6   :  { %362 = vmatprep.subr.bf16.mxu0 %v361_v5  ;;  %v393_v17 = vpack.c.bf16 %v137_v16, %v136_v14  ;;  %v36_v21 = vld [vmem:[%s565_s1 + $0x40] sm:$0xff]  ;;  %v37_v22 = vld [vmem:[%s565_s1 + $0x48] sm:$0xff]  ;;  %v397_v23 = vpack.c.bf16 %v139_v19, %v138_v18  ;;  %v140_v24 = vld [vmem:[%s567_s3 + $0x30] sm:$0xff] }
   0x7   :  { %390 = vmatprep.subr.bf16.mxu1 %v389_v15  ;;  %v141_v25 = vld [vmem:[%s567_s3 + $0x38] sm:$0xff]  ;;  %v373_v26 = vpack.c.bf16 %v37_v22, %v36_v21  ;;  %v38_v27 = vld [vmem:[%s565_s1 + $0x50] sm:$0xff]  ;;  %v142_v30 = vld [vmem:[%s567_s3 + $0x40] sm:$0xff] }
   0x8   :  { %392 = vmatpush3.bf16.msra.mxu1 %v389_v15  ;;  %v39_v28 = vld [vmem:[%s565_s1 + $0x58] sm:$0xff]  ;;  %v401_v29 = vpack.c.bf16 %v141_v25, %v140_v24  ;;  %v143_v31 = vld [vmem:[%s567_s3 + $0x48] sm:$0xff]  ;;  %v40_v33 = vld [vmem:[%s565_s1 + $0x60] sm:$0xff] }
   0x9   :  { %364 = vmatpush3.bf16.msra.mxu0 %v361_v5  ;;  %394 = vmatprep.subr.bf16.mxu1 %v393_v17  ;;  %v377_v32 = vpack.c.bf16 %v39_v28, %v38_v27  ;;  %v41_v34 = vld [vmem:[%s565_s1 + $0x68] sm:$0xff]  ;;  %v405_v35 = vpack.c.bf16 %v143_v31, %v142_v30  ;;  %v144_v36 = vld [vmem:[%s567_s3 + $0x50] sm:$0xff]  ;;  %v145_v37 = vld [vmem:[%s567_s3 + $0x58] sm:$0xff] }
   0xa   :  { %366 = vmatprep.subr.bf16.mxu0 %v365_v8  ;;  %v381_v38 = vpack.c.bf16 %v41_v34, %v40_v33  ;;  %v42_v39 = vld [vmem:[%s565_s1 + $0x70] sm:$0xff]  ;;  %v43_v40 = vld [vmem:[%s565_s1 + $0x78] sm:$0xff]  ;;  %v409_v41 = vpack.c.bf16 %v145_v37, %v144_v36  ;;  %v146_v42 = vld [vmem:[%s567_s3 + $0x60] sm:$0xff] }
   0xb   :  { %v147_v43 = vld [vmem:[%s567_s3 + $0x68] sm:$0xff]  ;;  %v385_v44 = vpack.c.bf16 %v43_v40, %v42_v39  ;;  %v148_v47 = vld [vmem:[%s567_s3 + $0x70] sm:$0xff]  ;;  %v149_v48 = vld [vmem:[%s567_s3 + $0x78] sm:$0xff] }
   0xc   :  { %396 = vmatpush3.bf16.msra.mxu1 %v393_v17  ;;  %v413_v45 = vpack.c.bf16 %v147_v43, %v146_v42  ;;  %v27_v46 = vld [vmem:[%s566_s0 + $0x8] sm:$0xff]  ;;  %v417_v49 = vpack.c.bf16 %v149_v48, %v148_v47  ;;  %v249_v50 = vld [vmem:[%s568_s2] ss:$0 sm:$0xff] }
   0xd   :  { %368 = vmatpush3.bf16.msra.mxu0 %v365_v8  ;;  %398 = vmatprep.subr.bf16.mxu1 %v397_v23  ;;  %v250_v57 = vld [vmem:[%s569_s4] ss:$0 sm:$0xff] }
   0xe   :  { %370 = vmatprep.subr.bf16.mxu0 %v369_v20 }
  0x10   :  { %400 = vmatpush3.bf16.msra.mxu1 %v397_v23 }
  0x11   :  { %372 = vmatpush3.bf16.msra.mxu0 %v369_v20  ;;  %402 = vmatprep.subr.bf16.mxu1 %v401_v29 }
  0x12   :  { %374 = vmatprep.subr.bf16.mxu0 %v373_v26 }
  0x14   :  { %404 = vmatpush3.bf16.msra.mxu1 %v401_v29 }
  0x15   :  { %376 = vmatpush3.bf16.msra.mxu0 %v373_v26  ;;  %406 = vmatprep.subr.bf16.mxu1 %v405_v35 }
  0x16   :  { %378 = vmatprep.subr.bf16.mxu0 %v377_v32 }
  0x18   :  { %408 = vmatpush3.bf16.msra.mxu1 %v405_v35 }
  0x19   :  { %380 = vmatpush3.bf16.msra.mxu0 %v377_v32  ;;  %410 = vmatprep.subr.bf16.mxu1 %v409_v41 }
  0x1a   :  { %382 = vmatprep.subr.bf16.mxu0 %v381_v38 }
  0x1c   :  { %412 = vmatpush3.bf16.msra.mxu1 %v409_v41 }
  0x1d   :  { %384 = vmatpush3.bf16.msra.mxu0 %v381_v38  ;;  %414 = vmatprep.subr.bf16.mxu1 %v413_v45 }
  0x1e   :  { %386 = vmatprep.subr.bf16.mxu0 %v385_v44 }
  0x20   :  { %416 = vmatpush3.bf16.msra.mxu1 %v413_v45 }
  0x21   :  { %388 = vmatpush3.bf16.msra.mxu0 %v385_v44  ;;  %418 = vmatprep.subr.bf16.mxu1 %v417_v49 }
  0x24   :  { %320 = vmatmul.mubr.f32.vlgmr.msra.gmra.mrb[0].mxu0 %v27_v46  ;;  %420 = vmatpush3.bf16.msra.mxu1 %v417_v49 }
  0xf7   :  { %v321_v51 = vpop.f32.mrb[0].mxu0 }
  0xf8   :  { %v123_v52 = vadd.f32 %v321_v51, %v249_v50  ;;  %v117_v53 = vpop.f32.mrb[1].mxu0 }
  0xf9   :  { %v118_v54 = vadd.f32 %v249_v50, %v117_v53 }
  0xfa   :  { %v127_v56 = vmax.f32 %v123_v52, 0.0 }
  0xfb   :  { %v126_v55 = vmax.f32 %v118_v54, 0.0 }
  0xfd   :  { %354 = vmatprep.mubr.f32.mxu1 %v126_v55 }
  0xfe   :  { %355 = vmatmul.mubr.f32.vlgmr.msra.gmra.mrb[0].mxu1 %v127_v56 }
 0x1d1   :  { %v356_v58 = vpop.f32.mrb[0].mxu1 }
 0x1d2   :  { %v242_v59 = vadd.f32 %v356_v58, %v250_v57  ;;  %v216_v60 = vpop.f32.mrb[1].mxu1 }
 0x1d3   :  { %v241_v61 = vadd.f32 %v250_v57, %v216_v60 }
 0x1d4   :  { %244 = vst [vmem:[%s570_s5 + $0x8] sm:$0xff] %v242_v59 }
 0x1d5   :  { %243 = vst [vmem:[%s570_s5] sm:$0xff] %v241_v61 }

// kernel: mlp_forward.1
= control target key start
LH: loop header
LB: loop body
LE: loop exit
PB: predicated region body
PF: predicated region fallthrough
CT: control target
= control target key end

     0   :  { %s565_s1 = inlined_call_operand.vmem [shape: f32[128,128], index: 1, kind: input, shape index: {}]   ;;  %s566_s0 = inlined_call_operand.vmem [shape: f32[16,128], index: 0, kind: input, shape index: {}]   ;;  %s567_s3 = inlined_call_operand.vmem [shape: f32[128,128], index: 3, kind: input, shape index: {}]   ;;  %s568_s2 = inlined_call_operand.vmem [shape: f32[1,128], index: 2, kind: input, shape index: {}]   ;;  %s569_s4 = inlined_call_operand.vmem [shape: f32[1,128], index: 4, kind: input, shape index: {}]   ;;  %s570_s5 = inlined_call_operand.vmem [shape: f32[16,128], index: 5, kind: output, shape index: {}]  }
   0x1   :  { %v28_v0 = vld [vmem:[%s565_s1] sm:$0xff]  ;;  %v29_v1 = vld [vmem:[%s565_s1 + $0x8] sm:$0xff]  ;;  %v30_v2 = vld [vmem:[%s565_s1 + $0x10] sm:$0xff] }
   0x2   :  { %v357_v3 = vpack.c.bf16 %v29_v1, %v28_v0  ;;  %v31_v4 = vld [vmem:[%s565_s1 + $0x18] sm:$0xff]  ;;  %v32_v6 = vld [vmem:[%s565_s1 + $0x20] sm:$0xff]  ;;  %v33_v7 = vld [vmem:[%s565_s1 + $0x28] sm:$0xff] }
   0x3   :  { %v361_v5 = vpack.c.bf16 %v31_v4, %v30_v2  ;;  %v365_v8 = vpack.c.bf16 %v33_v7, %v32_v6  ;;  %v34_v9 = vld [vmem:[%s565_s1 + $0x30] sm:$0xff]  ;;  %v35_v10 = vld [vmem:[%s565_s1 + $0x38] sm:$0xff]  ;;  %v26_v11 = vld [vmem:[%s566_s0] sm:$0xff] }
   0x4   :  { %358 = vmatprep.subr.bf16.mxu0 %v357_v3  ;;  %319 = vmatprep.mubr.f32.mxu0 %v26_v11  ;;  %v134_v12 = vld [vmem:[%s567_s3] sm:$0xff]  ;;  %v135_v13 = vld [vmem:[%s567_s3 + $0x8] sm:$0xff]  ;;  %v136_v14 = vld [vmem:[%s567_s3 + $0x10] sm:$0xff]  ;;  %v369_v20 = vpack.c.bf16 %v35_v10, %v34_v9 }
   0x5   :  { %360 = vmatpush3.bf16.msra.mxu0 %v357_v3  ;;  %v389_v15 = vpack.c.bf16 %v135_v13, %v134_v12  ;;  %v137_v16 = vld [vmem:[%s567_s3 + $0x18] sm:$0xff]  ;;  %v138_v18 = vld [vmem:[%s567_s3 + $0x20] sm:$0xff]  ;;  %v139_v19 = vld [vmem:[%s567_s3 + $0x28] sm:$0xff] }
   0x6   :  { %362 = vmatprep.subr.bf16.mxu0 %v361_v5  ;;  %v393_v17 = vpack.c.bf16 %v137_v16, %v136_v14  ;;  %v36_v21 = vld [vmem:[%s565_s1 + $0x40] sm:$0xff]  ;;  %v37_v22 = vld [vmem:[%s565_s1 + $0x48] sm:$0xff]  ;;  %v397_v23 = vpack.c.bf16 %v139_v19, %v138_v18  ;;  %v140_v24 = vld [vmem:[%s567_s3 + $0x30] sm:$0xff] }
   0x7   :  { %390 = vmatprep.subr.bf16.mxu1 %v389_v15  ;;  %v141_v25 = vld [vmem:[%s567_s3 + $0x38] sm:$0xff]  ;;  %v373_v26 = vpack.c.bf16 %v37_v22, %v36_v21  ;;  %v38_v27 = vld [vmem:[%s565_s1 + $0x50] sm:$0xff]  ;;  %v142_v30 = vld [vmem:[%s567_s3 + $0x40] sm:$0xff] }
   0x8   :  { %392 = vmatpush3.bf16.msra.mxu1 %v389_v15  ;;  %v39_v28 = vld [vmem:[%s565_s1 + $0x58] sm:$0xff]  ;;  %v401_v29 = vpack.c.bf16 %v141_v25, %v140_v24  ;;  %v143_v31 = vld [vmem:[%s567_s3 + $0x48] sm:$0xff]  ;;  %v40_v33 = vld [vmem:[%s565_s1 + $0x60] sm:$0xff] }
   0x9   :  { %364 = vmatpush3.bf16.msra.mxu0 %v361_v5  ;;  %394 = vmatprep.subr.bf16.mxu1 %v393_v17  ;;  %v377_v32 = vpack.c.bf16 %v39_v28, %v38_v27  ;;  %v41_v34 = vld [vmem:[%s565_s1 + $0x68] sm:$0xff]  ;;  %v405_v35 = vpack.c.bf16 %v143_v31, %v142_v30  ;;  %v144_v36 = vld [vmem:[%s567_s3 + $0x50] sm:$0xff]  ;;  %v145_v37 = vld [vmem:[%s567_s3 + $0x58] sm:$0xff] }
   0xa   :  { %366 = vmatprep.subr.bf16.mxu0 %v365_v8  ;;  %v381_v38 = vpack.c.bf16 %v41_v34, %v40_v33  ;;  %v42_v39 = vld [vmem:[%s565_s1 + $0x70] sm:$0xff]  ;;  %v43_v40 = vld [vmem:[%s565_s1 + $0x78] sm:$0xff]  ;;  %v409_v41 = vpack.c.bf16 %v145_v37, %v144_v36  ;;  %v146_v42 = vld [vmem:[%s567_s3 + $0x60] sm:$0xff] }
   0xb   :  { %v147_v43 = vld [vmem:[%s567_s3 + $0x68] sm:$0xff]  ;;  %v385_v44 = vpack.c.bf16 %v43_v40, %v42_v39  ;;  %v148_v47 = vld [vmem:[%s567_s3 + $0x70] sm:$0xff]  ;;  %v149_v48 = vld [vmem:[%s567_s3 + $0x78] sm:$0xff] }
   0xc   :  { %396 = vmatpush3.bf16.msra.mxu1 %v393_v17  ;;  %v413_v45 = vpack.c.bf16 %v147_v43, %v146_v42  ;;  %v27_v46 = vld [vmem:[%s566_s0 + $0x8] sm:$0xff]  ;;  %v417_v49 = vpack.c.bf16 %v149_v48, %v148_v47  ;;  %v249_v50 = vld [vmem:[%s568_s2] ss:$0 sm:$0xff] }
   0xd   :  { %368 = vmatpush3.bf16.msra.mxu0 %v365_v8  ;;  %398 = vmatprep.subr.bf16.mxu1 %v397_v23  ;;  %v250_v57 = vld [vmem:[%s569_s4] ss:$0 sm:$0xff] }
   0xe   :  { %370 = vmatprep.subr.bf16.mxu0 %v369_v20 }
  0x10   :  { %400 = vmatpush3.bf16.msra.mxu1 %v397_v23 }
  0x11   :  { %372 = vmatpush3.bf16.msra.mxu0 %v369_v20  ;;  %402 = vmatprep.subr.bf16.mxu1 %v401_v29 }
  0x12   :  { %374 = vmatprep.subr.bf16.mxu0 %v373_v26 }
  0x14   :  { %404 = vmatpush3.bf16.msra.mxu1 %v401_v29 }
  0x15   :  { %376 = vmatpush3.bf16.msra.mxu0 %v373_v26  ;;  %406 = vmatprep.subr.bf16.mxu1 %v405_v35 }
  0x16   :  { %378 = vmatprep.subr.bf16.mxu0 %v377_v32 }
  0x18   :  { %408 = vmatpush3.bf16.msra.mxu1 %v405_v35 }
  0x19   :  { %380 = vmatpush3.bf16.msra.mxu0 %v377_v32  ;;  %410 = vmatprep.subr.bf16.mxu1 %v409_v41 }
  0x1a   :  { %382 = vmatprep.subr.bf16.mxu0 %v381_v38 }
  0x1c   :  { %412 = vmatpush3.bf16.msra.mxu1 %v409_v41 }
  0x1d   :  { %384 = vmatpush3.bf16.msra.mxu0 %v381_v38  ;;  %414 = vmatprep.subr.bf16.mxu1 %v413_v45 }
  0x1e   :  { %386 = vmatprep.subr.bf16.mxu0 %v385_v44 }
  0x20   :  { %416 = vmatpush3.bf16.msra.mxu1 %v413_v45 }
  0x21   :  { %388 = vmatpush3.bf16.msra.mxu0 %v385_v44  ;;  %418 = vmatprep.subr.bf16.mxu1 %v417_v49 }
  0x24   :  { %320 = vmatmul.mubr.f32.vlgmr.msra.gmra.mrb[0].mxu0 %v27_v46  ;;  %420 = vmatpush3.bf16.msra.mxu1 %v417_v49 }
  0xf7   :  { %v321_v51 = vpop.f32.mrb[0].mxu0 }
  0xf8   :  { %v123_v52 = vadd.f32 %v321_v51, %v249_v50  ;;  %v117_v53 = vpop.f32.mrb[1].mxu0 }
  0xf9   :  { %v118_v54 = vadd.f32 %v249_v50, %v117_v53 }
  0xfa   :  { %v127_v56 = vmax.f32 %v123_v52, 0.0 }
  0xfb   :  { %v126_v55 = vmax.f32 %v118_v54, 0.0 }
  0xfd   :  { %354 = vmatprep.mubr.f32.mxu1 %v126_v55 }
  0xfe   :  { %355 = vmatmul.mubr.f32.vlgmr.msra.gmra.mrb[0].mxu1 %v127_v56 }
 0x1d1   :  { %v356_v58 = vpop.f32.mrb[0].mxu1 }
 0x1d2   :  { %v242_v59 = vadd.f32 %v356_v58, %v250_v57  ;;  %v216_v60 = vpop.f32.mrb[1].mxu1 }
 0x1d3   :  { %v241_v61 = vadd.f32 %v250_v57, %v216_v60 }
 0x1d4   :  { %244 = vst [vmem:[%s570_s5 + $0x8] sm:$0xff] %v242_v59 }
 0x1d5   :  { %243 = vst [vmem:[%s570_s5] sm:$0xff] %v241_v61 }

</bundles_post_ra>
